<compile_context>
chip_gen: v6e
topology: v6e:2x2x1
jax: 0.10.0
libtpu: 0.0.40
codegen_flags: <defaults>
</compile_context>

<pallas_src>
import functools
import itertools

import jax
import jax.numpy as jnp
import numpy as np
from jax.experimental import pallas as pl
from jax.experimental.pallas import tpu as pltpu

try:  # use scipy if present, otherwise a small exact brute-force solver
    from scipy.optimize import linear_sum_assignment as _scipy_lsa
except Exception:  # pragma: no cover
    _scipy_lsa = None


def _round_up(x, m):
    return ((x + m - 1) // m) * m


def _fast_recip(x):
    # EUP approx reciprocal + one Newton-Raphson step: ~f32-exact, no VPU divide.
    r = pl.reciprocal(x, approx=True)
    return r * (2.0 - x * r)


# ----------------------------------------------------------------------------
# VMEM budgeting / tile-size selection
# ----------------------------------------------------------------------------
def _vmem_capacity_bytes():
    try:
        info = pltpu.get_tpu_info()
        cap = getattr(info, "vmem_capacity_bytes", None)
        if cap:
            return int(cap)
    except Exception:
        pass
    return 128 * 1024 * 1024  # conservative default (v5e/v6e)


def _pick_vmem_limit(cap_bytes):
    # Half of physical VMEM, clamped to [32, 96] MiB: v7x (64 MiB) -> 32 MiB,
    # v5e/v6e (128 MiB) -> 64 MiB.
    return int(min(max(cap_bytes // 2, 32 * 1024 * 1024), 96 * 1024 * 1024))


_LIVE_TILE_TEMPS = 12  # conservative count of live [TM, NT_pad] f32 intermediates


def _pick_tm(nq8, nt_pad, nc, vmem_limit_bytes):
    """Largest multiple-of-8 divisor of nq8 whose tile working set fits ~60% of
    the VMEM budget.  Because tm divides nq8 exactly, queries are only padded
    to the next multiple of 8 (no 300 -> 512 blow-up)."""
    # resident, double-buffered side inputs: one-hot^T (bf16) + target stats (f32)
    fixed = 2 * (nc * nt_pad * 2 + 9 * nt_pad * 4)
    per_row = (_LIVE_TILE_TEMPS * nt_pad + 2 * (nc + 4 + nt_pad)) * 4
    budget = int(vmem_limit_bytes * 0.6) - fixed
    cap = max(8, (budget // max(per_row, 1)) // 8 * 8)
    tm, d = 8, 8
    while d <= nq8:
        if nq8 % d == 0 and d <= cap:
            tm = d
        d += 8
    return tm


# ----------------------------------------------------------------------------
# Pallas kernel: one [TM, NT_pad] tile of C = wb*L1 + wc*focal + wg*(-GIoU)
# for a single image (block-diagonal block of the original cost matrix).
# ----------------------------------------------------------------------------
def _make_cost_kernel(cost_class, cost_bbox, cost_giou, alpha, gamma):
    def kernel(logit_ref, pbox_ref, onehotT_ref, tstat_ref, cost_ref):
        f32 = jnp.float32

        # ---- classification (focal) cost, sigmoid fused, single log ----------
        # |x| <= 18.4207  <=>  sigmoid(x) in [1e-8, 1-1e-8]  (matches the
        # reference p-clamp, so the safe_log guards are unnecessary).
        XCLIP = 18.420681
        x = jnp.clip(logit_ref[...].astype(f32), -XCLIP, XCLIP)     # [TM, C]
        e = jnp.exp(-x)
        p = _fast_recip(1.0 + e)                                    # sigmoid(x)
        omp = e * p                                                 # 1 - sigmoid(x)
        L = jnp.log(1.0 + e)                                        # = -log(p); -log(1-p) = x + L
        if gamma == 2.0:                                            # avoid pow -> exp(g*log x)
            p_g, omp_g = p * p, omp * omp
        else:
            p_g, omp_g = p ** gamma, omp ** gamma
        neg = (1.0 - alpha) * p_g * (x + L)
        pos = alpha * omp_g * L
        # gather over target class ids == matmul with transposed one-hot [C, NT]
        cls_cost = jnp.dot(pos - neg, onehotT_ref[...].astype(f32),
                           preferred_element_type=f32)              # [TM, NT]
        cls_cost = jnp.clip(cls_cost, -100.0, 100.0)

        pb = pbox_ref[...].astype(f32)      # [TM, 4]  (cx, cy, w, h)
        ts = tstat_ref[...].astype(f32)     # [9, NT]  (cx, cy, w, h, x1, y1, x2, y2, area)

        pcx, pcy, pw, ph = pb[:, 0:1], pb[:, 1:2], pb[:, 2:3], pb[:, 3:4]   # [TM, 1]
        tcx, tcy, tw, th = ts[0:1], ts[1:2], ts[2:3], ts[3:4]               # [1, NT]
        tx1, ty1, tx2, ty2 = ts[4:5], ts[5:6], ts[6:7], ts[7:8]
        t_area = ts[8:9]

        # ---- L1 (cdist, p=1) cost --------------------------------------------
        l1 = (jnp.abs(pcx - tcx) + jnp.abs(pcy - tcy)
              + jnp.abs(pw - tw) + jnp.abs(ph - th))
        l1 = jnp.clip(l1, 0.0, 10.0)

        # ---- GIoU cost: small [TM,1]/[1,NT] operands, implicit broadcasting ----
        px1 = pcx - 0.5 * pw
        px2 = pcx + 0.5 * pw
        py1 = pcy - 0.5 * ph
        py2 = pcy + 0.5 * ph
        p_area = pw * ph                                             # [TM, 1]

        eps = 1e-8  # protects degenerate / dummy boxes; replaces post-hoc NaN scrubs
        iw = jnp.maximum(jnp.minimum(px2, tx2) - jnp.maximum(px1, tx1), 0.0)  # [TM,NT]
        cw = jnp.maximum(px2, tx2) - jnp.minimum(px1, tx1)                    # enclosing (>=0)
        ih = jnp.maximum(jnp.minimum(py2, ty2) - jnp.maximum(py1, ty1), 0.0)
        ch = jnp.maximum(py2, ty2) - jnp.minimum(py1, ty1)
        inter = iw * ih
        union = (p_area + t_area) - inter
        area_c = cw * ch
        iou = inter * _fast_recip(union + eps)
        giou = iou - (area_c - union) * _fast_recip(area_c + eps)
        g_cost = jnp.clip(-giou, -10.0, 10.0)

        # ---- total cost (finite by construction; _fix_cost_matrix is a no-op) --
        cost_ref[...] = cost_bbox * l1 + cost_class * cls_cost + cost_giou * g_cost

    return kernel


@functools.partial(
    jax.jit,
    static_argnames=("cost_class", "cost_bbox", "cost_giou", "alpha", "gamma",
                     "tm", "vmem_limit"),
)
def compute_cost_blocks(logits, boxes, onehot_t, tstat_t, *,
                        cost_class, cost_bbox, cost_giou, alpha, gamma, tm,
                        vmem_limit):
    """logits [bs,NQ_pad,C], boxes [bs,NQ_pad,4], onehot_t [bs,C,NT_pad] (bf16),
    tstat_t [bs,9,NT_pad] -> cost blocks [bs, NQ_pad, NT_pad] (f32)."""
    bs, nq_pad, nc = logits.shape
    nt_pad = onehot_t.shape[-1]
    kernel = _make_cost_kernel(cost_class, cost_bbox, cost_giou, alpha, gamma)
    return pl.pallas_call(
        kernel,
        out_shape=jax.ShapeDtypeStruct((bs, nq_pad, nt_pad), jnp.float32),
        grid_spec=pltpu.PrefetchScalarGridSpec(
            num_scalar_prefetch=0,
            grid=(bs, nq_pad // tm),
            in_specs=[
                pl.BlockSpec((None, tm, nc), lambda b, i: (b, i, 0)),       # logits tile
                pl.BlockSpec((None, tm, 4), lambda b, i: (b, i, 0)),        # pred boxes tile
                pl.BlockSpec((None, nc, nt_pad), lambda b, i: (b, 0, 0)),   # one-hot^T (resident)
                pl.BlockSpec((None, 9, nt_pad), lambda b, i: (b, 0, 0)),    # tgt stats^T (resident)
            ],
            out_specs=pl.BlockSpec((None, tm, nt_pad), lambda b, i: (b, i, 0)),
        ),
        compiler_params=pltpu.CompilerParams(
            dimension_semantics=("parallel", "parallel"),
            vmem_limit_bytes=vmem_limit,
        ),
    )(logits, boxes, onehot_t, tstat_t)


# ----------------------------------------------------------------------------
# Host-side linear assignment (no Pallas equivalent)
# ----------------------------------------------------------------------------
def _solve_lap(cost):
    # TODO(synk): the Hungarian linear-sum-assignment is sequential, host-side;
    # it has no clean Pallas/TPU equivalent so it stays in numpy/scipy.
    cost = np.asarray(cost, dtype=np.float64)
    n_rows, n_cols = cost.shape
    if n_rows == 0 or n_cols == 0:
        return np.array([], dtype=np.int64), np.array([], dtype=np.int64)
    if _scipy_lsa is not None:
        r, c = _scipy_lsa(cost)
        return r.astype(np.int64), c.astype(np.int64)
    # exact brute force for the small demo shapes
    transpose = n_rows < n_cols
    m = cost.T if transpose else cost
    R, K = m.shape  # R >= K
    best_rows, best_cost = None, np.inf
    for rows in itertools.permutations(range(R), K):
        total = m[list(rows), list(range(K))].sum()
        if total < best_cost:
            best_cost, best_rows = total, rows
    rows = np.array(best_rows, dtype=np.int64)
    cols = np.arange(K, dtype=np.int64)
    if transpose:
        rows, cols = cols, rows
    order = np.argsort(rows)
    return rows[order], cols[order]


# ----------------------------------------------------------------------------
# HungarianMatcher forward (JAX/Pallas)
# ----------------------------------------------------------------------------
class HungarianMatcherPallas:
    def __init__(self, cost_class=1.0, cost_bbox=1.0, cost_giou=1.0,
                 focal_alpha=0.25):
        assert cost_class != 0 or cost_bbox != 0 or cost_giou != 0, "all costs cant be 0"
        self.cost_class = float(cost_class)
        self.cost_bbox = float(cost_bbox)
        self.cost_giou = float(cost_giou)
        self.focal_alpha = float(focal_alpha)
        self._vmem_limit = _pick_vmem_limit(_vmem_capacity_bytes())

    def cost_blocks(self, outputs, targets):
        """Per-image cost blocks [bs, NQ_pad, NT_pad]; only [:, :nq, :sizes[i]]
        is meaningful (padded rows/columns are sliced off by the caller)."""
        logits = jnp.asarray(outputs["pred_logits"], jnp.float32)   # [bs, nq, C]
        boxes = jnp.asarray(outputs["pred_boxes"], jnp.float32)     # [bs, nq, 4]
        bs, nq, nc = logits.shape
        sizes = [int(t["boxes"].shape[0]) for t in targets]

        # --- pad targets to a lane-dense multiple of 128 with benign dummy boxes ---
        nt_pad = _round_up(max(max(sizes) if sizes else 0, 1), 128)

        # --- tile size: multiple-of-8 divisor of nq8 that fits the VMEM budget ---
        nq8 = _round_up(max(nq, 1), 8)
        tm = _pick_tm(nq8, nt_pad, nc, self._vmem_limit)
        nq_pad = nq8  # tm divides nq8 exactly -> minimal query padding
        if nq_pad > nq:
            logits = jnp.pad(logits, ((0, 0), (0, nq_pad - nq), (0, 0)))
            dummy_q = jnp.broadcast_to(
                jnp.array([0.5, 0.5, 1.0, 1.0], jnp.float32), (bs, nq_pad - nq, 4))
            boxes = jnp.concatenate([boxes, dummy_q], axis=1)

        dummy_box = jnp.array([[0.5, 0.5, 1.0, 1.0]], jnp.float32)
        lab_rows, box_rows = [], []
        for t, n in zip(targets, sizes):
            lab = jnp.asarray(t["labels"], jnp.int32).reshape(n)
            box = jnp.asarray(t["boxes"], jnp.float32).reshape(n, 4)
            lab_rows.append(jnp.concatenate(
                [lab, jnp.full((nt_pad - n,), -1, jnp.int32)]))
            box_rows.append(jnp.concatenate(
                [box, jnp.broadcast_to(dummy_box, (nt_pad - n, 4))], axis=0))
        labels_p = jnp.stack(lab_rows)                                   # [bs, NT_pad]
        boxes_p = jnp.stack(box_rows)                                    # [bs, NT_pad, 4]

        # one-hot built directly in transposed layout, bf16 (0/1 exact), -1 -> zero column
        onehot_t = (labels_p[:, None, :] ==
                    jnp.arange(nc, dtype=jnp.int32)[None, :, None]
                    ).astype(jnp.bfloat16)                               # [bs, C, NT_pad]

        # target stats precomputed once: cx, cy, w, h, x1, y1, x2, y2, area
        tcx, tcy = boxes_p[..., 0], boxes_p[..., 1]
        tw, th = boxes_p[..., 2], boxes_p[..., 3]
        tstat_t = jnp.stack(
            [tcx, tcy, tw, th,
             tcx - 0.5 * tw, tcy - 0.5 * th, tcx + 0.5 * tw, tcy + 0.5 * th,
             tw * th], axis=1).astype(jnp.float32)                       # [bs, 9, NT_pad]

        return compute_cost_blocks(
            logits, boxes, onehot_t, tstat_t,
            cost_class=self.cost_class, cost_bbox=self.cost_bbox,
            cost_giou=self.cost_giou, alpha=self.focal_alpha, gamma=2.0,
            tm=tm, vmem_limit=self._vmem_limit)

    def __call__(self, outputs, targets, group_detr=1):
        bs, nq, _ = outputs["pred_logits"].shape
        sizes = [int(t["boxes"].shape[0]) for t in targets]
        max_nt = max(sizes) if sizes else 0

        # Slice to the valid region on device before the D2H copy (padded
        # query rows / target columns are never read by the solver).
        C_dev = self.cost_blocks(outputs, targets)[:, :nq, :max_nt]
        C = np.asarray(jax.block_until_ready(C_dev))   # [bs, nq, max_nt]

        g_num_queries = nq // group_detr
        indices = None
        for g_i in range(group_detr):
            q0 = g_i * g_num_queries
            indices_g = []
            for i in range(bs):
                # costs are finite by construction (all terms clipped, eps'd
                # denominators), so the reference's nan_to_num pass is a no-op.
                c = C[i, q0:q0 + g_num_queries, :sizes[i]]
                indices_g.append(_solve_lap(c))
            if g_i == 0:
                indices = indices_g
            else:
                indices = [
                    (np.concatenate([a[0], b[0] + g_num_queries * g_i]),
                     np.concatenate([a[1], b[1]]))
                    for a, b in zip(indices, indices_g)
                ]
        return [(np.asarray(i, dtype=np.int64), np.asarray(j, dtype=np.int64))
                for i, j in indices]


# ----------------------------------------------------------------------------
# Pure-numpy reference for one image's cost block (validation only)
# ----------------------------------------------------------------------------
def _cost_matrix_ref(out_prob, tgt_ids, out_bbox, tgt_bbox,
                     wc, wb, wg, alpha=0.25, gamma=2.0):
    p = np.clip(np.asarray(out_prob, np.float64), 1e-8, 1 - 1e-8)
    neg = (1 - alpha) * p ** gamma * -np.log(np.maximum(1 - p, 1e-8))
    pos = alpha * (1 - p) ** gamma * -np.log(np.maximum(p, 1e-8))
    cls = np.clip(pos[:, tgt_ids] - neg[:, tgt_ids], -100.0, 100.0)
    pb = np.asarray(out_bbox, np.float64)
    tb = np.asarray(tgt_bbox, np.float64)
    l1 = np.clip(np.abs(pb[:, None, :] - tb[None, :, :]).sum(-1), 0.0, 10.0)
    pxy = np.concatenate([pb[:, :2] - 0.5 * pb[:, 2:], pb[:, :2] + 0.5 * pb[:, 2:]], -1)
    txy = np.concatenate([tb[:, :2] - 0.5 * tb[:, 2:], tb[:, :2] + 0.5 * tb[:, 2:]], -1)
    ap = (pxy[:, 2] - pxy[:, 0]) * (pxy[:, 3] - pxy[:, 1])
    at = (txy[:, 2] - txy[:, 0]) * (txy[:, 3] - txy[:, 1])
    lt = np.maximum(pxy[:, None, :2], txy[None, :, :2])
    rb = np.minimum(pxy[:, None, 2:], txy[None, :, 2:])
    wh = np.clip(rb - lt, 0, None)
    inter = wh[..., 0] * wh[..., 1]
    union = ap[:, None] + at[None, :] - inter
    iou = inter / union
    lt2 = np.minimum(pxy[:, None, :2], txy[None, :, :2])
    rb2 = np.maximum(pxy[:, None, 2:], txy[None, :, 2:])
    wh2 = np.clip(rb2 - lt2, 0, None)
    ac = wh2[..., 0] * wh2[..., 1]
    giou_cost = np.clip(-(iou - (ac - union) / ac), -10.0, 10.0)
    return wb * l1 + wc * cls + wg * giou_cost


if __name__ == "__main__":
    key = jax.random.PRNGKey(0)
    bs, num_queries, num_classes = 2, 8, 8
    sizes = [3, 2]  # targets per image

    k1, k2, k3, k4 = jax.random.split(key, 4)
    pred_logits = jax.random.normal(k1, (bs, num_queries, num_classes), jnp.float32)
    pred_cxcy = jax.random.uniform(k2, (bs, num_queries, 2), minval=0.25, maxval=0.75)
    pred_wh = jax.random.uniform(k3, (bs, num_queries, 2), minval=0.1, maxval=0.3)
    pred_boxes = jnp.concatenate([pred_cxcy, pred_wh], axis=-1).astype(jnp.float32)

    targets = []
    tk = k4
    for n in sizes:
        tk, ka, kb, kc = jax.random.split(tk, 4)
        labels = jax.random.randint(ka, (n,), 0, num_classes)
        cxcy = jax.random.uniform(kb, (n, 2), minval=0.25, maxval=0.75)
        wh = jax.random.uniform(kc, (n, 2), minval=0.1, maxval=0.3)
        targets.append({"labels": labels,
                        "boxes": jnp.concatenate([cxcy, wh], -1).astype(jnp.float32)})

    outputs = {"pred_logits": pred_logits, "pred_boxes": pred_boxes}
    matcher = HungarianMatcherPallas(cost_class=2.0, cost_bbox=5.0, cost_giou=2.0,
                                     focal_alpha=0.25)

    # Run the Pallas cost-block kernel and block on it.
    C = np.asarray(jax.block_until_ready(matcher.cost_blocks(outputs, targets)))

    # Validate each per-image block against a pure-numpy reference.
    logits_np = np.asarray(pred_logits, np.float64)
    prob_np = 1.0 / (1.0 + np.exp(-logits_np))
    boxes_np = np.asarray(pred_boxes, np.float64)
    for i in range(bs):
        tgt_ids_np = np.asarray(targets[i]["labels"])
        tgt_box_np = np.asarray(targets[i]["boxes"], np.float64)
        C_ref = _cost_matrix_ref(prob_np[i], tgt_ids_np, boxes_np[i], tgt_box_np,
                                 wc=2.0, wb=5.0, wg=2.0)
        np.testing.assert_allclose(C[i, :num_queries, :sizes[i]], C_ref,
                                   rtol=1e-3, atol=1e-3)

    # Full forward: host-side Hungarian assignment on the kernel's cost blocks.
    indices = matcher(outputs, targets, group_detr=1)
    assert len(indices) == bs
    for (i_idx, j_idx), n in zip(indices, sizes):
        assert len(i_idx) == len(j_idx) == min(num_queries, n)

    # group_detr > 1 path (host-side concat logic only).
    g = 2
    indices_g = matcher(outputs, targets, group_detr=g)
    for (i_idx, j_idx), n in zip(indices_g, sizes):
        assert len(i_idx) == len(j_idx) == g * min(num_queries // g, n)

    print("KERNEL_OK")
</pallas_src>

<mosaic_0001>
module attributes {stable_mosaic.version = 11 : i64} {
  func.func @kernel(%arg0: i32, %arg1: i32, %arg2: memref<1x8x8xf32, #tpu.memory_space<vmem>>, %arg3: memref<1x8x4xf32, #tpu.memory_space<vmem>>, %arg4: memref<1x8x128xbf16, #tpu.memory_space<vmem>>, %arg5: memref<1x9x128xf32, #tpu.memory_space<vmem>>, %arg6: memref<1x8x128xf32, #tpu.memory_space<vmem>>) attributes {dimension_semantics = [#tpu.dimension_semantics<parallel>, #tpu.dimension_semantics<parallel>], iteration_bounds = array<i64: 2, 1>, scalar_prefetch = 0 : i64, scratch_operands = 0 : i64, tpu.core_type = #tpu.core_type<tc>, window_params = [{transform_indices = @transform_0, window_bounds = array<i64: 1, 8, 8>}, {transform_indices = @transform_1, window_bounds = array<i64: 1, 8, 4>}, {transform_indices = @transform_2, window_bounds = array<i64: 1, 8, 128>}, {transform_indices = @transform_3, window_bounds = array<i64: 1, 9, 128>}, {transform_indices = @transform_4, window_bounds = array<i64: 1, 8, 128>}]} {
    %c0 = arith.constant 0 : index
    %c0_0 = arith.constant 0 : index
    %c0_1 = arith.constant 0 : index
    %0 = vector.load %arg2[%c0, %c0_0, %c0_1] : memref<1x8x8xf32, #tpu.memory_space<vmem>>, vector<1x8x8xf32>
    %1 = vector.shape_cast %0 : vector<1x8x8xf32> to vector<8x8xf32>
    %cst = arith.constant -18.420681 : f32
    %cst_2 = arith.constant 18.420681 : f32
    %2 = vector.broadcast %cst : f32 to vector<8x8xf32>
    %3 = arith.maximumf %2, %1 : vector<8x8xf32>
    %4 = vector.broadcast %cst_2 : f32 to vector<8x8xf32>
    %5 = arith.minimumf %4, %3 : vector<8x8xf32>
    %cst_3 = arith.constant 0.000000e+00 : f32
    %6 = vector.broadcast %cst_3 : f32 to vector<8x8xf32>
    %7 = arith.subf %6, %5 : vector<8x8xf32>
    %8 = math.exp %7 : vector<8x8xf32>
    %cst_4 = arith.constant 1.000000e+00 : f32
    %9 = vector.broadcast %cst_4 : f32 to vector<8x8xf32>
    %10 = arith.addf %9, %8 : vector<8x8xf32>
    %11 = tpu.reciprocal %10 {approx = true} : vector<8x8xf32> -> vector<8x8xf32>
    %12 = arith.mulf %10, %11 : vector<8x8xf32>
    %cst_5 = arith.constant 2.000000e+00 : f32
    %13 = vector.broadcast %cst_5 : f32 to vector<8x8xf32>
    %14 = arith.subf %13, %12 : vector<8x8xf32>
    %15 = arith.mulf %11, %14 : vector<8x8xf32>
    %16 = arith.mulf %8, %15 : vector<8x8xf32>
    %cst_6 = arith.constant 1.000000e+00 : f32
    %17 = vector.broadcast %cst_6 : f32 to vector<8x8xf32>
    %18 = arith.addf %17, %8 : vector<8x8xf32>
    %19 = math.log %18 : vector<8x8xf32>
    %20 = arith.mulf %15, %15 : vector<8x8xf32>
    %21 = arith.mulf %16, %16 : vector<8x8xf32>
    %cst_7 = arith.constant 7.500000e-01 : f32
    %22 = vector.broadcast %cst_7 : f32 to vector<8x8xf32>
    %23 = arith.mulf %22, %20 : vector<8x8xf32>
    %24 = arith.addf %5, %19 : vector<8x8xf32>
    %25 = arith.mulf %23, %24 : vector<8x8xf32>
    %cst_8 = arith.constant 2.500000e-01 : f32
    %26 = vector.broadcast %cst_8 : f32 to vector<8x8xf32>
    %27 = arith.mulf %26, %21 : vector<8x8xf32>
    %28 = arith.mulf %27, %19 : vector<8x8xf32>
    %29 = arith.subf %28, %25 : vector<8x8xf32>
    %c0_9 = arith.constant 0 : index
    %c0_10 = arith.constant 0 : index
    %c0_11 = arith.constant 0 : index
    %30 = vector.load %arg4[%c0_9, %c0_10, %c0_11] : memref<1x8x128xbf16, #tpu.memory_space<vmem>>, vector<1x8x128xbf16>
    %31 = vector.shape_cast %30 : vector<1x8x128xbf16> to vector<8x128xbf16>
    %32 = arith.extf %31 : vector<8x128xbf16> to vector<8x128xf32>
    %cst_12 = arith.constant dense<0.000000e+00> : vector<8x128xf32>
    %33 = tpu.matmul %29, %32, %cst_12 {dimension_numbers = #tpu.dot_dimension_numbers<[1], [0], [0], [1], [0, 0, 1, 1], [], []>} : vector<8x8xf32>, vector<8x128xf32>, vector<8x128xf32> -> vector<8x128xf32>
    %cst_13 = arith.constant -1.000000e+02 : f32
    %cst_14 = arith.constant 1.000000e+02 : f32
    %34 = vector.broadcast %cst_13 : f32 to vector<8x128xf32>
    %35 = arith.maximumf %34, %33 : vector<8x128xf32>
    %36 = vector.broadcast %cst_14 : f32 to vector<8x128xf32>
    %37 = arith.minimumf %36, %35 : vector<8x128xf32>
    %c0_15 = arith.constant 0 : index
    %c0_16 = arith.constant 0 : index
    %c0_17 = arith.constant 0 : index
    %38 = vector.load %arg3[%c0_15, %c0_16, %c0_17] : memref<1x8x4xf32, #tpu.memory_space<vmem>>, vector<1x8x4xf32>
    %39 = vector.shape_cast %38 : vector<1x8x4xf32> to vector<8x4xf32>
    %c0_18 = arith.constant 0 : index
    %c0_19 = arith.constant 0 : index
    %c0_20 = arith.constant 0 : index
    %40 = vector.load %arg5[%c0_18, %c0_19, %c0_20] : memref<1x9x128xf32, #tpu.memory_space<vmem>>, vector<1x9x128xf32>
    %41 = vector.shape_cast %40 : vector<1x9x128xf32> to vector<9x128xf32>
    %42 = vector.extract_strided_slice %39 {offsets = [0, 0], sizes = [8, 1], strides = [1, 1]} : vector<8x4xf32> to vector<8x1xf32>
    %43 = vector.extract_strided_slice %39 {offsets = [0, 1], sizes = [8, 1], strides = [1, 1]} : vector<8x4xf32> to vector<8x1xf32>
    %44 = vector.extract_strided_slice %39 {offsets = [0, 2], sizes = [8, 1], strides = [1, 1]} : vector<8x4xf32> to vector<8x1xf32>
    %45 = vector.extract_strided_slice %39 {offsets = [0, 3], sizes = [8, 1], strides = [1, 1]} : vector<8x4xf32> to vector<8x1xf32>
    %46 = vector.extract_strided_slice %41 {offsets = [0, 0], sizes = [1, 128], strides = [1, 1]} : vector<9x128xf32> to vector<1x128xf32>
    %47 = vector.extract_strided_slice %41 {offsets = [1, 0], sizes = [1, 128], strides = [1, 1]} : vector<9x128xf32> to vector<1x128xf32>
    %48 = vector.extract_strided_slice %41 {offsets = [2, 0], sizes = [1, 128], strides = [1, 1]} : vector<9x128xf32> to vector<1x128xf32>
    %49 = vector.extract_strided_slice %41 {offsets = [3, 0], sizes = [1, 128], strides = [1, 1]} : vector<9x128xf32> to vector<1x128xf32>
    %50 = vector.extract_strided_slice %41 {offsets = [4, 0], sizes = [1, 128], strides = [1, 1]} : vector<9x128xf32> to vector<1x128xf32>
    %51 = vector.extract_strided_slice %41 {offsets = [5, 0], sizes = [1, 128], strides = [1, 1]} : vector<9x128xf32> to vector<1x128xf32>
    %52 = vector.extract_strided_slice %41 {offsets = [6, 0], sizes = [1, 128], strides = [1, 1]} : vector<9x128xf32> to vector<1x128xf32>
    %53 = vector.extract_strided_slice %41 {offsets = [7, 0], sizes = [1, 128], strides = [1, 1]} : vector<9x128xf32> to vector<1x128xf32>
    %54 = vector.extract_strided_slice %41 {offsets = [8, 0], sizes = [1, 128], strides = [1, 1]} : vector<9x128xf32> to vector<1x128xf32>
    %55 = vector.broadcast %42 : vector<8x1xf32> to vector<8x128xf32>
    %56 = vector.broadcast %46 : vector<1x128xf32> to vector<8x128xf32>
    %57 = arith.subf %55, %56 : vector<8x128xf32>
    %58 = math.absf %57 : vector<8x128xf32>
    %59 = vector.broadcast %43 : vector<8x1xf32> to vector<8x128xf32>
    %60 = vector.broadcast %47 : vector<1x128xf32> to vector<8x128xf32>
    %61 = arith.subf %59, %60 : vector<8x128xf32>
    %62 = math.absf %61 : vector<8x128xf32>
    %63 = arith.addf %58, %62 : vector<8x128xf32>
    %64 = vector.broadcast %44 : vector<8x1xf32> to vector<8x128xf32>
    %65 = vector.broadcast %48 : vector<1x128xf32> to vector<8x128xf32>
    %66 = arith.subf %64, %65 : vector<8x128xf32>
    %67 = math.absf %66 : vector<8x128xf32>
    %68 = arith.addf %63, %67 : vector<8x128xf32>
    %69 = vector.broadcast %45 : vector<8x1xf32> to vector<8x128xf32>
    %70 = vector.broadcast %49 : vector<1x128xf32> to vector<8x128xf32>
    %71 = arith.subf %69, %70 : vector<8x128xf32>
    %72 = math.absf %71 : vector<8x128xf32>
    %73 = arith.addf %68, %72 : vector<8x128xf32>
    %cst_21 = arith.constant 0.000000e+00 : f32
    %cst_22 = arith.constant 1.000000e+01 : f32
    %74 = vector.broadcast %cst_21 : f32 to vector<8x128xf32>
    %75 = arith.maximumf %74, %73 : vector<8x128xf32>
    %76 = vector.broadcast %cst_22 : f32 to vector<8x128xf32>
    %77 = arith.minimumf %76, %75 : vector<8x128xf32>
    %cst_23 = arith.constant 5.000000e-01 : f32
    %78 = vector.broadcast %cst_23 : f32 to vector<8x1xf32>
    %79 = arith.mulf %78, %44 : vector<8x1xf32>
    %80 = arith.subf %42, %79 : vector<8x1xf32>
    %cst_24 = arith.constant 5.000000e-01 : f32
    %81 = vector.broadcast %cst_24 : f32 to vector<8x1xf32>
    %82 = arith.mulf %81, %44 : vector<8x1xf32>
    %83 = arith.addf %42, %82 : vector<8x1xf32>
    %cst_25 = arith.constant 5.000000e-01 : f32
    %84 = vector.broadcast %cst_25 : f32 to vector<8x1xf32>
    %85 = arith.mulf %84, %45 : vector<8x1xf32>
    %86 = arith.subf %43, %85 : vector<8x1xf32>
    %cst_26 = arith.constant 5.000000e-01 : f32
    %87 = vector.broadcast %cst_26 : f32 to vector<8x1xf32>
    %88 = arith.mulf %87, %45 : vector<8x1xf32>
    %89 = arith.addf %43, %88 : vector<8x1xf32>
    %90 = arith.mulf %44, %45 : vector<8x1xf32>
    %91 = vector.broadcast %83 : vector<8x1xf32> to vector<8x128xf32>
    %92 = vector.broadcast %52 : vector<1x128xf32> to vector<8x128xf32>
    %93 = arith.minimumf %91, %92 : vector<8x128xf32>
    %94 = vector.broadcast %80 : vector<8x1xf32> to vector<8x128xf32>
    %95 = vector.broadcast %50 : vector<1x128xf32> to vector<8x128xf32>
    %96 = arith.maximumf %94, %95 : vector<8x128xf32>
    %97 = arith.subf %93, %96 : vector<8x128xf32>
    %cst_27 = arith.constant 0.000000e+00 : f32
    %98 = vector.broadcast %cst_27 : f32 to vector<8x128xf32>
    %99 = arith.maximumf %97, %98 : vector<8x128xf32>
    %100 = vector.broadcast %83 : vector<8x1xf32> to vector<8x128xf32>
    %101 = vector.broadcast %52 : vector<1x128xf32> to vector<8x128xf32>
    %102 = arith.maximumf %100, %101 : vector<8x128xf32>
    %103 = vector.broadcast %80 : vector<8x1xf32> to vector<8x128xf32>
    %104 = vector.broadcast %50 : vector<1x128xf32> to vector<8x128xf32>
    %105 = arith.minimumf %103, %104 : vector<8x128xf32>
    %106 = arith.subf %102, %105 : vector<8x128xf32>
    %107 = vector.broadcast %89 : vector<8x1xf32> to vector<8x128xf32>
    %108 = vector.broadcast %53 : vector<1x128xf32> to vector<8x128xf32>
    %109 = arith.minimumf %107, %108 : vector<8x128xf32>
    %110 = vector.broadcast %86 : vector<8x1xf32> to vector<8x128xf32>
    %111 = vector.broadcast %51 : vector<1x128xf32> to vector<8x128xf32>
    %112 = arith.maximumf %110, %111 : vector<8x128xf32>
    %113 = arith.subf %109, %112 : vector<8x128xf32>
    %cst_28 = arith.constant 0.000000e+00 : f32
    %114 = vector.broadcast %cst_28 : f32 to vector<8x128xf32>
    %115 = arith.maximumf %113, %114 : vector<8x128xf32>
    %116 = vector.broadcast %89 : vector<8x1xf32> to vector<8x128xf32>
    %117 = vector.broadcast %53 : vector<1x128xf32> to vector<8x128xf32>
    %118 = arith.maximumf %116, %117 : vector<8x128xf32>
    %119 = vector.broadcast %86 : vector<8x1xf32> to vector<8x128xf32>
    %120 = vector.broadcast %51 : vector<1x128xf32> to vector<8x128xf32>
    %121 = arith.minimumf %119, %120 : vector<8x128xf32>
    %122 = arith.subf %118, %121 : vector<8x128xf32>
    %123 = arith.mulf %99, %115 : vector<8x128xf32>
    %124 = vector.broadcast %90 : vector<8x1xf32> to vector<8x128xf32>
    %125 = vector.broadcast %54 : vector<1x128xf32> to vector<8x128xf32>
    %126 = arith.addf %124, %125 : vector<8x128xf32>
    %127 = arith.subf %126, %123 : vector<8x128xf32>
    %128 = arith.mulf %106, %122 : vector<8x128xf32>
    %cst_29 = arith.constant 9.99999993E-9 : f32
    %129 = vector.broadcast %cst_29 : f32 to vector<8x128xf32>
    %130 = arith.addf %127, %129 : vector<8x128xf32>
    %131 = tpu.reciprocal %130 {approx = true} : vector<8x128xf32> -> vector<8x128xf32>
    %132 = arith.mulf %130, %131 : vector<8x128xf32>
    %cst_30 = arith.constant 2.000000e+00 : f32
    %133 = vector.broadcast %cst_30 : f32 to vector<8x128xf32>
    %134 = arith.subf %133, %132 : vector<8x128xf32>
    %135 = arith.mulf %131, %134 : vector<8x128xf32>
    %136 = arith.mulf %123, %135 : vector<8x128xf32>
    %137 = arith.subf %128, %127 : vector<8x128xf32>
    %cst_31 = arith.constant 9.99999993E-9 : f32
    %138 = vector.broadcast %cst_31 : f32 to vector<8x128xf32>
    %139 = arith.addf %128, %138 : vector<8x128xf32>
    %140 = tpu.reciprocal %139 {approx = true} : vector<8x128xf32> -> vector<8x128xf32>
    %141 = arith.mulf %139, %140 : vector<8x128xf32>
    %cst_32 = arith.constant 2.000000e+00 : f32
    %142 = vector.broadcast %cst_32 : f32 to vector<8x128xf32>
    %143 = arith.subf %142, %141 : vector<8x128xf32>
    %144 = arith.mulf %140, %143 : vector<8x128xf32>
    %145 = arith.mulf %137, %144 : vector<8x128xf32>
    %146 = arith.subf %136, %145 : vector<8x128xf32>
    %cst_33 = arith.constant 0.000000e+00 : f32
    %147 = vector.broadcast %cst_33 : f32 to vector<8x128xf32>
    %148 = arith.subf %147, %146 : vector<8x128xf32>
    %cst_34 = arith.constant -1.000000e+01 : f32
    %cst_35 = arith.constant 1.000000e+01 : f32
    %149 = vector.broadcast %cst_34 : f32 to vector<8x128xf32>
    %150 = arith.maximumf %149, %148 : vector<8x128xf32>
    %151 = vector.broadcast %cst_35 : f32 to vector<8x128xf32>
    %152 = arith.minimumf %151, %150 : vector<8x128xf32>
    %cst_36 = arith.constant 5.000000e+00 : f32
    %153 = vector.broadcast %cst_36 : f32 to vector<8x128xf32>
    %154 = arith.mulf %153, %77 : vector<8x128xf32>
    %cst_37 = arith.constant 2.000000e+00 : f32
    %155 = vector.broadcast %cst_37 : f32 to vector<8x128xf32>
    %156 = arith.mulf %155, %37 : vector<8x128xf32>
    %157 = arith.addf %154, %156 : vector<8x128xf32>
    %cst_38 = arith.constant 2.000000e+00 : f32
    %158 = vector.broadcast %cst_38 : f32 to vector<8x128xf32>
    %159 = arith.mulf %158, %152 : vector<8x128xf32>
    %160 = arith.addf %157, %159 : vector<8x128xf32>
    %c0_39 = arith.constant 0 : index
    %c0_40 = arith.constant 0 : index
    %c0_41 = arith.constant 0 : index
    %161 = vector.load %arg6[%c0_39, %c0_40, %c0_41] : memref<1x8x128xf32, #tpu.memory_space<vmem>>, vector<1x8x128xf32>
    %162 = vector.shape_cast %161 : vector<1x8x128xf32> to vector<8x128xf32>
    %163 = vector.shape_cast %160 : vector<8x128xf32> to vector<1x8x128xf32>
    tpu.vector_store %arg6[%c0_39, %c0_40, %c0_41], %163 {strides = array<i32>} : memref<1x8x128xf32, #tpu.memory_space<vmem>>, vector<1x8x128xf32>,
    return
  }
  func.func @transform_0(%arg0: i32, %arg1: i32) -> (i32, i32, i32) {
    %c0_i32 = arith.constant 0 : i32
    %c0_i32_0 = arith.constant 0 : i32
    return %arg0, %arg1, %c0_i32 : i32, i32, i32
  }
  func.func @transform_1(%arg0: i32, %arg1: i32) -> (i32, i32, i32) {
    %c0_i32 = arith.constant 0 : i32
    %c0_i32_0 = arith.constant 0 : i32
    return %arg0, %arg1, %c0_i32 : i32, i32, i32
  }
  func.func @transform_2(%arg0: i32, %arg1: i32) -> (i32, i32, i32) {
    %c0_i32 = arith.constant 0 : i32
    %c0_i32_0 = arith.constant 0 : i32
    %c0_i32_1 = arith.constant 0 : i32
    return %arg0, %c0_i32, %c0_i32_0 : i32, i32, i32
  }
  func.func @transform_3(%arg0: i32, %arg1: i32) -> (i32, i32, i32) {
    %c0_i32 = arith.constant 0 : i32
    %c0_i32_0 = arith.constant 0 : i32
    %c0_i32_1 = arith.constant 0 : i32
    return %arg0, %c0_i32, %c0_i32_0 : i32, i32, i32
  }
  func.func @transform_4(%arg0: i32, %arg1: i32) -> (i32, i32, i32) {
    %c0_i32 = arith.constant 0 : i32
    %c0_i32_0 = arith.constant 0 : i32
    return %arg0, %arg1, %c0_i32 : i32, i32, i32
  }
}

</mosaic_0001>

<bundles_post_ra>
// kernel: compute_cost_blocks.1
= control target key start
LH: loop header
LB: loop body
LE: loop exit
PB: predicated region body
PF: predicated region fallthrough
CT: control target
= control target key end

     0   :  { %9 = vsyncpa [#allocation3], 0  ;;  %s990_s0 = inlined_call_operand.vmem [shape: f32[2,8,8], index: 0, kind: input, shape index: {}]   ;;  %s991_s1 = inlined_call_operand.vmem [shape: f32[2,8,4], index: 1, kind: input, shape index: {}]   ;;  %s992_s2 = inlined_call_operand.vmem [shape: bf16[2,8,128], index: 2, kind: input, shape index: {}]   ;;  %s993_s3 = inlined_call_operand.vmem [shape: f32[2,9,128], index: 3, kind: input, shape index: {}]   ;;  %s994_s4 = inlined_call_operand.hbm [shape: f32[2,8,128], index: 4, kind: output, shape index: {}]  }
   0x1   :  { %11 = vsyncpa [#allocation3 + $0x1], 0  ;;  %s874_s15 = smov 0   ;;  %s876_s16 = smov 0  }
   0x2   :  { %s878_s17 = smov 0   ;;  %s880_s18 = smov 0  }
   0x3   :  { %s882_s19 = smov 0   ;;  %s884_s20 = smov 0  }
   0x4 LB: > { %s652_s21 = sadd.s32 4294967295, %s838_s20   ;;  %s653_s22 = sadd.s32 4294967294, %s838_s20   ;;  %s838_s20 = sphi %s884_s20, %s17_s20   ;;  %s834_s19 = sphi %s882_s19, %s1001_s19   ;;  %s830_s18 = sphi %s880_s18, %s1000_s18   ;;  %s826_s17 = sphi %s878_s17, %s999_s17   ;;  %s822_s16 = sphi %s876_s16, %s998_s16   ;;  %s818_s15 = sphi %s874_s15, %s997_s15  }
   0x5   : > { %s29_s23 = sadd.s32 1, %s834_s19  ;;  %s146_s24 = sadd.s32 1, %s826_s17 }
   0x6   : > { %p31_p0 = scmp.ge.s32.totalorder %s29_s23, 2  ;;  %p156_p1 = scmp.ne.s32.totalorder %s826_s17, %s822_s16 }
   0x7   : > { %p157_p2 = scmp.eq.s32.totalorder %s652_s21, 1  ;;  %p162_p3 = scmp.ne.s32.totalorder %s822_s16, %s818_s15 }
   0x8   : > { %s1003_s23 = smov (%p31_p0, %s29_s23), 0  ;;  %p163_p5 = scmp.eq.s32.totalorder %s653_s22, 1 }
   0x9   : > { %p914_p4 = por %p157_p2, %p156_p1  ;;  %s141_s26 = ssub.s32 %s834_s19, %s1003_s23 }
   0xa   : > { %p656_p6 = scmp.ge.s32.totalorder %s838_s20, 1  ;;  %p144_p7 = scmp.eq.s32.totalorder %s141_s26, 0 }
   0xb   : > { %p921_p8 = por %p163_p5, %p162_p3  ;;  %p216_p9 = scmp.lt.s32.totalorder %s838_s20, 3 }
   0xc   : > { %s927_s28 = scalar_select %p144_p7, %s826_s17, %s146_s24  }
   0xd   : > { %p217_p10 = pnand %p656_p6, %p216_p9 }
   0xe   : > { %p260_p11 = scmp.lt.s32.totalorder (!%p217_p10), %s830_s18, 1  ;;  %s844_s21 = smov (!%p217_p10), 126  }
   0xf   : > { %220 = sbr.rel (%p217_p10) target bundleno = 334 (0x14e), region = 36  ;;  %s845_s22 = smov (!%p217_p10), 127  }
  0x10   : > { %s669_s7 = sshll.u32 (!%p217_p10), %s830_s18, 7 }
  0x11   : > { %s540_s12 = scalar_lea.hbm (!%p217_p10), %s994_s4, %s669_s7 }
  0x14   : > { %v840_v0 = vmov 0.0   ;;  %vm841_vm0 = vmmov 0   ;;  %s931_s29 = scalar_select %p260_p11, %s830_s18, 1  ;;  %v842_v1 = vmov 1   ;;  %v843_v2 = vmov 0  }
  0x15   : > { %675 = vmatprep.subr.mxu0 %v840_v0  ;;  %677 = vmatprep.mubr.msk.f32.mxu0 %vm841_vm0, %v840_v0  ;;  %vm307_vm1 = vcmask 64512   ;;  %v846_v32 = vmov 3   ;;  %v847_v34 = vmov 2   ;;  %v391_v35 = vlaneseq }
  0x16   : > { %744 = vset.pattern.permute.xlu0 %v842_v1  ;;  %743 = vset.pattern.permute.xlu1 %v843_v2  ;;  %s658_s30 = sshll.u32 %s931_s29, 3  ;;  %s660_s5 = sshll.u32 %s931_s29, 2 }
  0x17   : > { %s273_s8 = scalar_lea.vmem %s991_s1, %s658_s30  ;;  %s277_s11 = scalar_lea.vmem %s992_s2, %s660_s5  ;;  %v392_v36 = vshrl.u32 %v391_v35, 7 }
  0x18   : > { %v383_v3 = vld [vmem:[%s273_s8] sm:$0xff]  ;;  %s266_s14 = scalar_lea.vmem %s990_s0, %s658_s30  ;;  %s672_s24 = sshll.u32 %s931_s29, 4 }
  0x19   : > { %v305_v4 = vld [vmem:[%s277_s11] sm:$0xf]  ;;  %v432_v5 = vmul.f32 0.5, %v383_v3  ;;  %s282_s5 = scalar_lea.vmem %s993_s3, %s672_s24  ;;  %v460_v37 = vsub.s32 4, %v392_v36  ;;  %v450_v38 = vsub.s32 6, %v392_v36  ;;  %v474_v41 = vsub.s32 7, %v392_v36 }
  0x1a   : > { %v306_v6 = vunpack.c.l.bf16 %v305_v4  ;;  %v283_v7 = vld [vmem:[%s266_s14] sm:$0xff]  ;;  %v483_v43 = vsub.s32 5, %v392_v36  ;;  %v393_v57 = vsub.s32 0, %v392_v36  ;;  %s257_s29 = sand.u32 1, %s822_s16  }
  0x1b   : > { %v663_v8 = vclamps-f32 %v283_v7, 18.420681  ;;  %434 = vrot.lane.b32.xlu0 %v432_v5, %s844_s21  ;;  %v384_v40 = vld [vmem:[%s282_s5] sm:$0xff]  ;;  %s657_s6 = sshll.u32 %s257_s29, 3  ;;  %s528_s13 = scalar_lea.sflag [#allocation3], %s257_s29 }
  0x1c   : > { %676 = vmatpush3.msra.mxu0 %v306_v6  ;;  %v461_v42 = vrot.slane %v384_v40, %v460_v37  ;;  %v451_v45 = vrot.slane %v384_v40, %v450_v38  ;;  %v475_v47 = vrot.slane %v384_v40, %v474_v41  ;;  %v484_v51 = vrot.slane %v384_v40, %v483_v43  ;;  %s259_s8 = scalar_lea.vmem [#allocation2], %s657_s6  ;;  %s848_s21 = smov [#allocation2]  }
  0x1d   : > { %v286_v9 = vsub.f32 0.0, %v663_v8  ;;  %v394_v7 = vrot.slane %v384_v40, %v393_v57  ;;  %s542_s9 = sshll.u32 %s259_s8, 4  ;;  %s543_s9 = int_to_ptr.vmem [resolvable:$true] %s542_s9 }
  0x1e   : > { %s762_s14 = scalar_lea.vmem %s543_s9, 128 }
  0x1f   : > { %v287_v10 = vmul.f32 1.442695, %v286_v9  ;;  %439 = vrot.lane.b32.xlu0 %v383_v3, %s845_s22  ;;  %p763_p12 = scmp.ne.s32.totalorder %s543_s9, %s762_s14  ;;  %s766_s22 = sshll.u32 %s848_s21, 4  ;;  %s767_s22 = int_to_ptr.vmem [resolvable:$false] %s766_s22 }
  0x20   : > { %s768_s18 = scalar_lea.vmem %s767_s22, 256  ;;  %p769_p1 = scmp.lt.s32.totalorder %s543_s9, %s767_s22 }
  0x21   : > { %752 = vpow2.f32 %v287_v10  ;;  %p764_p13 = pnand %p763_p12, %p914_p4  ;;  %p770_p2 = scmp.lt.s32.totalorder %s768_s18, %s762_s14 }
  0x23   : > { %p765_p0 = pneg %p764_p13  ;;  %p771_p3 = por %p770_p2, %p769_p1 }
  0x25   : > { %p772_p5 = pnand %p771_p3, %p765_p0 }
  0x2e   : > { %v753_v11 = vpop.eup %752 }
  0x2f   : > { %v289_v12 = vadd.f32 1.0, %v753_v11 }
  0x31   : > { %754 = vrcp.f32 %v289_v12 }
  0x32   : > { %756 = vlog2.f32 %v289_v12 }
  0x3e   : > { %v755_v13 = vpop.eup %754 }
  0x3f   : > { %v757_v14 = vpop.eup %756  ;;  %v291_v15 = vmul.f32 %v755_v13, %v289_v12 }
  0x40   : > { %v296_v17 = vmul.f32 0.6931472, %v757_v14 }
  0x41   : > { %v292_v16 = vsub.f32 2.0, %v291_v15 }
  0x42   : > { %v300_v21 = vadd.f32 %v663_v8, %v296_v17 }
  0x43   : > { %v293_v18 = vmul.f32 %v755_v13, %v292_v16  ;;  %v414_v13 = vsub.s32 2, %v392_v36  ;;  %v425_v16 = vsub.s32 3, %v392_v36 }
  0x45   : > { %v294_v19 = vmul.f32 %v753_v11, %v293_v18  ;;  %v297_v20 = vmul.f32 %v293_v18, %v293_v18 }
  0x47   : > { %v298_v22 = vmul.f32 %v294_v19, %v294_v19  ;;  %v299_v23 = vmul.f32 0.75, %v297_v20  ;;  %v415_v20 = vrot.slane %v384_v40, %v414_v13 }
  0x49   : > { %v301_v24 = vmul.f32 %v300_v21, %v299_v23  ;;  %v302_v25 = vmul.f32 0.25, %v298_v22  ;;  %v426_v23 = vrot.slane %v384_v40, %v425_v16 }
  0x4b   : > { %v303_v26 = vmul.f32 %v302_v25, %v296_v17 }
  0x4d   : > { %v304_v27 = vsub.f32 %v303_v26, %v301_v24 }
  0x4f   : > { %678 = vmatmul.mubr.msk.f32.vlgmr.msra.gmra.mxu0 %vm307_vm1, %v304_v27 }
  0x8d   : > { %v435_v28 = vpop.permute.xlu0 %434 }
  0x8e   : > { %v438_v29 = vadd.f32 %v435_v28, %v383_v3  ;;  %v437_v30 = vsub.f32 %v383_v3, %v435_v28 }
  0x90   : > { %469 = vperm.xlu0 %744, %v438_v29   ;;  %445 = vperm.xlu1 %743, %v438_v29  }
  0x91   : > { %v440_v31 = vpop.permute.xlu0 %439 }
  0x92   : > { %v442_v33 = vmul.f32 %v440_v31, %v383_v3 }
  0x94   : > { %455 = vperm.xlu1 %743, %v437_v30   ;;  %747 = vset.pattern.permute.xlu0 %v843_v2  ;;  %v403_v2 = vsub.s32 1, %v392_v36 }
  0x95   : > { %388 = vperm.xlu0 %747, %v383_v3  }
  0x96   : > { %v404_v12 = vrot.slane %v384_v40, %v403_v2 }
  0x98   : > { %745 = vset.pattern.permute.xlu1 %v842_v1 }
  0x99   : > { %478 = vperm.xlu1 %745, %v437_v30   ;;  %750 = vset.pattern.permute.xlu0 %v846_v32 }
  0x9a   : > { %420 = vperm.xlu0 %750, %v383_v3  }
  0x9d   : > { %746 = vset.pattern.permute.xlu1 %v847_v34 }
  0x9e   : > { %494 = vperm.xlu1 %746, %v442_v33   ;;  %751 = vset.pattern.permute.xlu0 %v847_v34 }
  0xa2   : > { %748 = vset.pattern.permute.xlu1 %v842_v1  ;;  %v666_v1 = vld [vmem:[%s282_s5 + $0x8] ss:$0 sm:$0xff] }
  0xa3   : > { %398 = vperm.xlu1 %748, %v383_v3  }
  0xa7   : > { %749 = vset.pattern.permute.xlu1 %v847_v34 }
  0xa8   : > { %409 = vperm.xlu1 %749, %v383_v3  }
 0x10b   : > { %v446_v39 = vpop.permute.xlu1 %445  ;;  %v470_v49 = vpop.permute.xlu0 %469 }
 0x10c   : > { %v452_v52 = vmin.f32 %v446_v39, %v451_v45  ;;  %v465_v54 = vmax.f32 %v446_v39, %v451_v45  ;;  %v476_v55 = vmin.f32 %v470_v49, %v475_v47  ;;  %v488_v58 = vmax.f32 %v470_v49, %v475_v47 }
 0x10f   : > { %v948_v44 = vpop.f32.mrf.mxu0  ;;  %v456_v46 = vpop.permute.xlu1 %455 }
 0x110   : > { %v462_v50 = vmax.f32 %v456_v46, %v461_v42  ;;  %v466_v53 = vmin.f32 %v456_v46, %v461_v42  ;;  %v389_v9 = vpop.permute.xlu0 %388  ;;  %v665_v47 = vclamps-f32 %v948_v44, 100.0 }
 0x111   : > { %v679_v48 = vpop.f32.mrf.mxu0  ;;  %v395_v15 = vsub.f32 %v389_v9, %v394_v7 }
 0x112   : > { %v463_v59 = vsub.f32 %v452_v52, %v462_v50  ;;  %v467_v62 = vsub.f32 %v465_v54, %v466_v53 }
 0x113   : > { %v396_v22 = vand.u32 2147483647, %v395_v15 }
 0x114   : > { %v479_v56 = vpop.permute.xlu1 %478  ;;  %v464_v3 = vmax.f32 %v463_v59, 0.0 }
 0x115   : > { %v485_v60 = vmax.f32 %v479_v56, %v484_v51  ;;  %v489_v61 = vmin.f32 %v479_v56, %v484_v51  ;;  %v421_v24 = vpop.permute.xlu0 %420  ;;  %v522_v51 = vmul.f32 2.0, %v665_v47 }
 0x116   : > { %v427_v28 = vsub.f32 %v421_v24, %v426_v23 }
 0x117   : > { %v486_v63 = vsub.f32 %v476_v55, %v485_v60  ;;  %v490_v0 = vsub.f32 %v488_v58, %v489_v61 }
 0x118   : > { %v428_v31 = vand.u32 2147483647, %v427_v28 }
 0x119   : > { %v487_v4 = vmax.f32 %v486_v63, 0.0  ;;  %v503_v5 = vmul.f32 %v490_v0, %v467_v62  ;;  %v495_v6 = vpop.permute.xlu1 %494 }
 0x11a   : > { %v501_v8 = vadd.f32 %v666_v1, %v495_v6 }
 0x11b   : > { %v511_v10 = vadd.f32 1e-08, %v503_v5  ;;  %v491_v11 = vmul.f32 %v487_v4, %v464_v3 }
 0x11d   : > { %758 = vrcp.f32 %v511_v10  ;;  %v502_v14 = vsub.f32 %v501_v8, %v491_v11 }
 0x11e   : > { %v399_v17 = vpop.permute.xlu1 %398 }
 0x11f   : > { %v504_v18 = vadd.f32 1e-08, %v502_v14  ;;  %v405_v19 = vsub.f32 %v399_v17, %v404_v12  ;;  %v510_v42 = vsub.f32 %v503_v5, %v502_v14 }
 0x121   : > { %760 = vrcp.f32 %v504_v18  ;;  %v406_v21 = vand.u32 2147483647, %v405_v19 }
 0x123   : > { %v410_v25 = vpop.permute.xlu1 %409  ;;  %v407_v27 = vadd.f32 %v406_v21, %v396_v22 }
 0x124   : > { %v416_v26 = vsub.f32 %v410_v25, %v415_v20 }
 0x126   : > { %v417_v29 = vand.u32 2147483647, %v416_v26 }
 0x128   : > { %v418_v30 = vadd.f32 %v417_v29, %v407_v27 }
 0x12a   : > { %v759_v32 = vpop.eup %758  ;;  %v429_v35 = vadd.f32 %v428_v31, %v418_v30 }
 0x12b   : > { %v513_v33 = vmul.f32 %v759_v32, %v511_v10 }
 0x12c   : > { %v430_v41 = vmax.f32 %v429_v35, 0.0 }
 0x12d   : > { %v514_v34 = vsub.f32 2.0, %v513_v33 }
 0x12e   : > { %v761_v36 = vpop.eup %760  ;;  %v431_v46 = vmin.f32 %v430_v41, 10.0 }
 0x12f   : > { %v506_v37 = vmul.f32 %v761_v36, %v504_v18  ;;  %v515_v39 = vmul.f32 %v759_v32, %v514_v34 }
 0x130   : > { %v521_v49 = vmul.f32 5.0, %v431_v46 }
 0x131   : > { %v507_v38 = vsub.f32 2.0, %v506_v37  ;;  %v516_v45 = vmul.f32 %v515_v39, %v510_v42 }
 0x132   : > { %v523_v53 = vadd.f32 %v522_v51, %v521_v49 }
 0x133   : > { %v508_v40 = vmul.f32 %v761_v36, %v507_v38 }
 0x135   : > { %v509_v43 = vmul.f32 %v508_v40, %v491_v11 }
 0x137   : > { %v517_v48 = vsub.f32 %v509_v43, %v516_v45 }
 0x139   : > { %v518_v50 = vsub.f32 0.0, %v517_v48 }
 0x13b   : > { %v667_v52 = vclamps-f32 %v518_v50, 10.0 }
 0x13d   : > { %v524_v54 = vmul.f32 2.0, %v667_v52 }
 0x13f   : > { %v525_v55 = vadd.f32 %v524_v54, %v523_v53 }
 0x141   : > { %526 = vst [vmem:[%s259_s8] sm:$0xff] %v525_v55 }
 0x142   : > { %775 = shalt.err (!%p772_p5)
}
 0x143   : > { %s776_s24 = scalar_lea.hbm %s540_s12, 128  ;;  %s780_s5 = scalar_lea.hbm %s994_s4, 256 }
 0x144   : > { %p777_p6 = scmp.ne.s32.totalorder %s540_s12, %s776_s24  ;;  %p781_p10 = scmp.lt.s32.totalorder %s540_s12, %s994_s4 }
 0x145   : > { %p782_p11 = scmp.lt.s32.totalorder %s780_s5, %s776_s24 }
 0x146   : > { %p778_p7 = pnand %p777_p6, %p914_p4 }
 0x147   : > { %p783_p12 = por %p782_p11, %p781_p10 }
 0x148   : > { %p779_p9 = pneg %p778_p7 }
 0x14a   : > { %p784_p13 = pnand %p783_p12, %p779_p9 }
 0x14c   : > { %787 = shalt.err (!%p784_p13)
}
 0x14d   : > { %680 = dma.vmem_to_hbm [thread:$0]  (%p914_p4), %s543_s9, 128, %s540_s12, %s528_s13  }
 0x14e PF: > { %p686_p0 = scmp.ge.s32.totalorder %s838_s20, 2  ;;  %s554_s7 = sand.u32 1, %s818_s15  }
 0x14f   : > { %s555_s8 = scalar_lea.sflag [#allocation3], %s554_s7 }
 0x150   : > { %p683_p1 = pnand %p686_p0, %p921_p8 }
 0x152   : > { %p684_p2 = pneg %p683_p1 }
 0x154   : > { %813 = dma.done.wait (%p684_p2), %s555_s8, 128  }
 0x155   : > { %815 = vsyncadd (%p684_p2), %s555_s8, 4294967168  ;;  %s17_s20 = sadd.s32 1, %s838_s20   ;;  %s997_s15 = smov %s822_s16 }
 0x156   : > { %p14_p3 = scmp.ge.s32.totalorder %s17_s20, 4   ;;  %s998_s16 = smov %s826_s17 }
 0x157   : > { %s999_s17 = smov %s927_s28  ;;  %s1000_s18 = smov %s834_s19 }
 0x158   : > { %s1001_s19 = smov %s1003_s23  ;;  %16 = sbr.rel (!%p14_p3) target bundleno = 4 (0x4), region = 80 }
 0x15d   :  { %560 = vsyncpa [#allocation3], 1 }
 0x15e   :  { %562 = vsyncpa [#allocation3 + $0x1], 1 }

</bundles_post_ra>
